<compile_context>
chip_gen: v5e
topology: v5e:2x2
jax: 0.10.0
libtpu: 0.0.40
codegen_flags: <defaults>
</compile_context>

<pallas_src>
import functools

import numpy as np
import jax
import jax.numpy as jnp
from jax import lax
from jax.experimental import pallas as pl
from jax.experimental.pallas import tpu as pltpu


def convpsf_kernel(x_ref, psf_ref, out_ref, *, C: int, K: int, L: int, pad: int):
    # x_ref  : (tn, C, L)  VMEM input block (raw input; halo handled in-kernel)
    # psf_ref: (C, K)      SMEM taps (scalar reads)
    # out_ref: (tn, L)     lane-dense VMEM output block
    x = x_ref[...]
    tn = x.shape[0]

    ex = jnp.exp(x.astype(jnp.float32))                  # (tn, C, L), EUP transcendental

    acc = jnp.zeros((tn, L), jnp.float32)
    if pad > 0:
        zhalo = jnp.zeros((tn, pad), jnp.float32)

    # out[n, l] = sum_c sum_k psf[c, k] * exp(x)[n, c, l + k - pad]   (zero padded)
    for c in range(C):
        exc = ex[:, c, :]                                # (tn, L)  one sublane extract / channel
        if pad > 0:
            exc = jnp.concatenate([zhalo, exc, zhalo], axis=-1)   # (tn, L + K - 1)
        for k in range(K):
            # static lane-offset slice + scalar(SMEM)-broadcast MAC on the VPU
            acc = acc + psf_ref[c, k] * exc[:, k:k + L]

    out_ref[...] = jnp.log(acc)


def conv_psf_forward(x, psf):
    """x: (N, C, L) float32, psf: (C, K) float32.

    Returns (psf[None], conv_psf) with conv_psf of shape (N, 1, L), matching the
    PyTorch module's (psf, conv_psf) output.
    """
    N, C, L = x.shape
    Cw, K = psf.shape
    assert Cw == C and K % 2 == 1
    pad = (K - 1) // 2

    # Batch tile: sublane-aligned 8-row tiles when N allows, else the whole batch.
    tn = 8 if (N % 8 == 0) else N
    grid = (N // tn,)

    kern = functools.partial(convpsf_kernel, C=C, K=K, L=L, pad=pad)
    out = pl.pallas_call(
        kern,
        out_shape=jax.ShapeDtypeStruct((N, L), jnp.float32),   # lane-dense, no size-1 dim
        grid=grid,
        in_specs=[
            pl.BlockSpec((tn, C, L), lambda i: (i, 0, 0)),
            pl.BlockSpec(memory_space=pltpu.MemorySpace.SMEM),   # whole (C, K) tap table in SMEM
        ],
        out_specs=pl.BlockSpec((tn, L), lambda i: (i, 0)),
        compiler_params=pltpu.CompilerParams(
            # Independent batch tiles -> megacore sharding on v7x.
            dimension_semantics=("parallel",)),
    )(x, psf)

    conv_psf = out[:, None, :]   # add the size-1 conv1d out-channel dim in the wrapper
    return psf[None], conv_psf


def _reference(x, psf):
    """Pure-JAX reference: log(conv1d(exp(x), psf, padding='same'))."""
    ex = jnp.exp(x)
    pad = (psf.shape[1] - 1) // 2
    out = lax.conv_general_dilated(
        ex, psf[None],                       # rhs: (O=1, I=C, K)
        window_strides=(1,),
        padding=[(pad, pad)],
        dimension_numbers=("NCH", "OIH", "NCH"),
    )
    return jnp.log(out)


if __name__ == "__main__":
    N, C, L, K = 2, 4, 16, 9

    key = jax.random.PRNGKey(0)
    x = jax.random.normal(key, (N, C, L), dtype=jnp.float32)

    # Deterministic synthetic PSF: positive Gaussian-shaped taps per channel
    # (stand-in for loadmat('PSF.mat')['PSF']).
    taps = np.arange(K, dtype=np.float32) - (K - 1) / 2.0
    psf_np = np.stack(
        [np.exp(-(taps ** 2) / (2.0 * (1.0 + 0.5 * c) ** 2)) for c in range(C)],
        axis=0,
    ).astype(np.float32)
    psf_np /= psf_np.sum()
    psf = jnp.asarray(psf_np)

    psf_out, conv_psf = conv_psf_forward(x, psf)
    conv_psf = jax.block_until_ready(conv_psf)

    ref = _reference(x, psf)
    np.testing.assert_allclose(np.asarray(conv_psf), np.asarray(ref),
                               rtol=1e-4, atol=1e-5)
    assert psf_out.shape == (1, C, K)
    assert conv_psf.shape == (N, 1, L)

    print("KERNEL_OK")
</pallas_src>

<mosaic_0001>
module attributes {stable_mosaic.version = 11 : i64} {
  func.func @convpsf_kernel(%arg0: i32, %arg1: memref<2x4x16xf32, #tpu.memory_space<vmem>>, %arg2: memref<4x9xf32, #tpu.memory_space<smem>>, %arg3: memref<2x16xf32, #tpu.memory_space<vmem>>) attributes {dimension_semantics = [#tpu.dimension_semantics<parallel>], iteration_bounds = array<i64: 1>, scalar_prefetch = 0 : i64, scratch_operands = 0 : i64, tpu.core_type = #tpu.core_type<tc>, window_params = [{transform_indices = @transform_0, window_bounds = array<i64: 2, 4, 16>}, {transform_indices = @transform_1, window_bounds = array<i64: 4, 9>}, {transform_indices = @transform_2, window_bounds = array<i64: 2, 16>}]} {
    %c0 = arith.constant 0 : index
    %c0_0 = arith.constant 0 : index
    %c0_1 = arith.constant 0 : index
    %0 = vector.load %arg1[%c0, %c0_0, %c0_1] : memref<2x4x16xf32, #tpu.memory_space<vmem>>, vector<2x4x16xf32>
    %1 = math.exp %0 : vector<2x4x16xf32>
    %cst = arith.constant 0.000000e+00 : f32
    %2 = vector.broadcast %cst : f32 to vector<2x16xf32>
    %cst_2 = arith.constant 0.000000e+00 : f32
    %3 = vector.broadcast %cst_2 : f32 to vector<2x4xf32>
    %4 = vector.extract_strided_slice %1 {offsets = [0, 0, 0], sizes = [2, 1, 16], strides = [1, 1, 1]} : vector<2x4x16xf32> to vector<2x1x16xf32>
    %5 = vector.shape_cast %4 : vector<2x1x16xf32> to vector<2x16xf32>
    %6 = tpu.concatenate %3, %5, %3 in 1 : vector<2x4xf32>, vector<2x16xf32>, vector<2x4xf32> -> vector<2x24xf32>
    %c0_3 = arith.constant 0 : index
    %c0_4 = arith.constant 0 : index
    %7 = memref.load %arg2[%c0_3, %c0_4] : memref<4x9xf32, #tpu.memory_space<smem>>
    %8 = vector.extract_strided_slice %6 {offsets = [0, 0], sizes = [2, 16], strides = [1, 1]} : vector<2x24xf32> to vector<2x16xf32>
    %9 = vector.broadcast %7 : f32 to vector<2x16xf32>
    %10 = arith.mulf %9, %8 : vector<2x16xf32>
    %11 = arith.addf %2, %10 : vector<2x16xf32>
    %c0_5 = arith.constant 0 : index
    %c1 = arith.constant 1 : index
    %12 = memref.load %arg2[%c0_5, %c1] : memref<4x9xf32, #tpu.memory_space<smem>>
    %13 = vector.extract_strided_slice %6 {offsets = [0, 1], sizes = [2, 16], strides = [1, 1]} : vector<2x24xf32> to vector<2x16xf32>
    %14 = vector.broadcast %12 : f32 to vector<2x16xf32>
    %15 = arith.mulf %14, %13 : vector<2x16xf32>
    %16 = arith.addf %11, %15 : vector<2x16xf32>
    %c0_6 = arith.constant 0 : index
    %c2 = arith.constant 2 : index
    %17 = memref.load %arg2[%c0_6, %c2] : memref<4x9xf32, #tpu.memory_space<smem>>
    %18 = vector.extract_strided_slice %6 {offsets = [0, 2], sizes = [2, 16], strides = [1, 1]} : vector<2x24xf32> to vector<2x16xf32>
    %19 = vector.broadcast %17 : f32 to vector<2x16xf32>
    %20 = arith.mulf %19, %18 : vector<2x16xf32>
    %21 = arith.addf %16, %20 : vector<2x16xf32>
    %c0_7 = arith.constant 0 : index
    %c3 = arith.constant 3 : index
    %22 = memref.load %arg2[%c0_7, %c3] : memref<4x9xf32, #tpu.memory_space<smem>>
    %23 = vector.extract_strided_slice %6 {offsets = [0, 3], sizes = [2, 16], strides = [1, 1]} : vector<2x24xf32> to vector<2x16xf32>
    %24 = vector.broadcast %22 : f32 to vector<2x16xf32>
    %25 = arith.mulf %24, %23 : vector<2x16xf32>
    %26 = arith.addf %21, %25 : vector<2x16xf32>
    %c0_8 = arith.constant 0 : index
    %c4 = arith.constant 4 : index
    %27 = memref.load %arg2[%c0_8, %c4] : memref<4x9xf32, #tpu.memory_space<smem>>
    %28 = vector.extract_strided_slice %6 {offsets = [0, 4], sizes = [2, 16], strides = [1, 1]} : vector<2x24xf32> to vector<2x16xf32>
    %29 = vector.broadcast %27 : f32 to vector<2x16xf32>
    %30 = arith.mulf %29, %28 : vector<2x16xf32>
    %31 = arith.addf %26, %30 : vector<2x16xf32>
    %c0_9 = arith.constant 0 : index
    %c5 = arith.constant 5 : index
    %32 = memref.load %arg2[%c0_9, %c5] : memref<4x9xf32, #tpu.memory_space<smem>>
    %33 = vector.extract_strided_slice %6 {offsets = [0, 5], sizes = [2, 16], strides = [1, 1]} : vector<2x24xf32> to vector<2x16xf32>
    %34 = vector.broadcast %32 : f32 to vector<2x16xf32>
    %35 = arith.mulf %34, %33 : vector<2x16xf32>
    %36 = arith.addf %31, %35 : vector<2x16xf32>
    %c0_10 = arith.constant 0 : index
    %c6 = arith.constant 6 : index
    %37 = memref.load %arg2[%c0_10, %c6] : memref<4x9xf32, #tpu.memory_space<smem>>
    %38 = vector.extract_strided_slice %6 {offsets = [0, 6], sizes = [2, 16], strides = [1, 1]} : vector<2x24xf32> to vector<2x16xf32>
    %39 = vector.broadcast %37 : f32 to vector<2x16xf32>
    %40 = arith.mulf %39, %38 : vector<2x16xf32>
    %41 = arith.addf %36, %40 : vector<2x16xf32>
    %c0_11 = arith.constant 0 : index
    %c7 = arith.constant 7 : index
    %42 = memref.load %arg2[%c0_11, %c7] : memref<4x9xf32, #tpu.memory_space<smem>>
    %43 = vector.extract_strided_slice %6 {offsets = [0, 7], sizes = [2, 16], strides = [1, 1]} : vector<2x24xf32> to vector<2x16xf32>
    %44 = vector.broadcast %42 : f32 to vector<2x16xf32>
    %45 = arith.mulf %44, %43 : vector<2x16xf32>
    %46 = arith.addf %41, %45 : vector<2x16xf32>
    %c0_12 = arith.constant 0 : index
    %c8 = arith.constant 8 : index
    %47 = memref.load %arg2[%c0_12, %c8] : memref<4x9xf32, #tpu.memory_space<smem>>
    %48 = vector.extract_strided_slice %6 {offsets = [0, 8], sizes = [2, 16], strides = [1, 1]} : vector<2x24xf32> to vector<2x16xf32>
    %49 = vector.broadcast %47 : f32 to vector<2x16xf32>
    %50 = arith.mulf %49, %48 : vector<2x16xf32>
    %51 = arith.addf %46, %50 : vector<2x16xf32>
    %52 = vector.extract_strided_slice %1 {offsets = [0, 1, 0], sizes = [2, 1, 16], strides = [1, 1, 1]} : vector<2x4x16xf32> to vector<2x1x16xf32>
    %53 = vector.shape_cast %52 : vector<2x1x16xf32> to vector<2x16xf32>
    %54 = tpu.concatenate %3, %53, %3 in 1 : vector<2x4xf32>, vector<2x16xf32>, vector<2x4xf32> -> vector<2x24xf32>
    %c1_13 = arith.constant 1 : index
    %c0_14 = arith.constant 0 : index
    %55 = memref.load %arg2[%c1_13, %c0_14] : memref<4x9xf32, #tpu.memory_space<smem>>
    %56 = vector.extract_strided_slice %54 {offsets = [0, 0], sizes = [2, 16], strides = [1, 1]} : vector<2x24xf32> to vector<2x16xf32>
    %57 = vector.broadcast %55 : f32 to vector<2x16xf32>
    %58 = arith.mulf %57, %56 : vector<2x16xf32>
    %59 = arith.addf %51, %58 : vector<2x16xf32>
    %c1_15 = arith.constant 1 : index
    %c1_16 = arith.constant 1 : index
    %60 = memref.load %arg2[%c1_15, %c1_16] : memref<4x9xf32, #tpu.memory_space<smem>>
    %61 = vector.extract_strided_slice %54 {offsets = [0, 1], sizes = [2, 16], strides = [1, 1]} : vector<2x24xf32> to vector<2x16xf32>
    %62 = vector.broadcast %60 : f32 to vector<2x16xf32>
    %63 = arith.mulf %62, %61 : vector<2x16xf32>
    %64 = arith.addf %59, %63 : vector<2x16xf32>
    %c1_17 = arith.constant 1 : index
    %c2_18 = arith.constant 2 : index
    %65 = memref.load %arg2[%c1_17, %c2_18] : memref<4x9xf32, #tpu.memory_space<smem>>
    %66 = vector.extract_strided_slice %54 {offsets = [0, 2], sizes = [2, 16], strides = [1, 1]} : vector<2x24xf32> to vector<2x16xf32>
    %67 = vector.broadcast %65 : f32 to vector<2x16xf32>
    %68 = arith.mulf %67, %66 : vector<2x16xf32>
    %69 = arith.addf %64, %68 : vector<2x16xf32>
    %c1_19 = arith.constant 1 : index
    %c3_20 = arith.constant 3 : index
    %70 = memref.load %arg2[%c1_19, %c3_20] : memref<4x9xf32, #tpu.memory_space<smem>>
    %71 = vector.extract_strided_slice %54 {offsets = [0, 3], sizes = [2, 16], strides = [1, 1]} : vector<2x24xf32> to vector<2x16xf32>
    %72 = vector.broadcast %70 : f32 to vector<2x16xf32>
    %73 = arith.mulf %72, %71 : vector<2x16xf32>
    %74 = arith.addf %69, %73 : vector<2x16xf32>
    %c1_21 = arith.constant 1 : index
    %c4_22 = arith.constant 4 : index
    %75 = memref.load %arg2[%c1_21, %c4_22] : memref<4x9xf32, #tpu.memory_space<smem>>
    %76 = vector.extract_strided_slice %54 {offsets = [0, 4], sizes = [2, 16], strides = [1, 1]} : vector<2x24xf32> to vector<2x16xf32>
    %77 = vector.broadcast %75 : f32 to vector<2x16xf32>
    %78 = arith.mulf %77, %76 : vector<2x16xf32>
    %79 = arith.addf %74, %78 : vector<2x16xf32>
    %c1_23 = arith.constant 1 : index
    %c5_24 = arith.constant 5 : index
    %80 = memref.load %arg2[%c1_23, %c5_24] : memref<4x9xf32, #tpu.memory_space<smem>>
    %81 = vector.extract_strided_slice %54 {offsets = [0, 5], sizes = [2, 16], strides = [1, 1]} : vector<2x24xf32> to vector<2x16xf32>
    %82 = vector.broadcast %80 : f32 to vector<2x16xf32>
    %83 = arith.mulf %82, %81 : vector<2x16xf32>
    %84 = arith.addf %79, %83 : vector<2x16xf32>
    %c1_25 = arith.constant 1 : index
    %c6_26 = arith.constant 6 : index
    %85 = memref.load %arg2[%c1_25, %c6_26] : memref<4x9xf32, #tpu.memory_space<smem>>
    %86 = vector.extract_strided_slice %54 {offsets = [0, 6], sizes = [2, 16], strides = [1, 1]} : vector<2x24xf32> to vector<2x16xf32>
    %87 = vector.broadcast %85 : f32 to vector<2x16xf32>
    %88 = arith.mulf %87, %86 : vector<2x16xf32>
    %89 = arith.addf %84, %88 : vector<2x16xf32>
    %c1_27 = arith.constant 1 : index
    %c7_28 = arith.constant 7 : index
    %90 = memref.load %arg2[%c1_27, %c7_28] : memref<4x9xf32, #tpu.memory_space<smem>>
    %91 = vector.extract_strided_slice %54 {offsets = [0, 7], sizes = [2, 16], strides = [1, 1]} : vector<2x24xf32> to vector<2x16xf32>
    %92 = vector.broadcast %90 : f32 to vector<2x16xf32>
    %93 = arith.mulf %92, %91 : vector<2x16xf32>
    %94 = arith.addf %89, %93 : vector<2x16xf32>
    %c1_29 = arith.constant 1 : index
    %c8_30 = arith.constant 8 : index
    %95 = memref.load %arg2[%c1_29, %c8_30] : memref<4x9xf32, #tpu.memory_space<smem>>
    %96 = vector.extract_strided_slice %54 {offsets = [0, 8], sizes = [2, 16], strides = [1, 1]} : vector<2x24xf32> to vector<2x16xf32>
    %97 = vector.broadcast %95 : f32 to vector<2x16xf32>
    %98 = arith.mulf %97, %96 : vector<2x16xf32>
    %99 = arith.addf %94, %98 : vector<2x16xf32>
    %100 = vector.extract_strided_slice %1 {offsets = [0, 2, 0], sizes = [2, 1, 16], strides = [1, 1, 1]} : vector<2x4x16xf32> to vector<2x1x16xf32>
    %101 = vector.shape_cast %100 : vector<2x1x16xf32> to vector<2x16xf32>
    %102 = tpu.concatenate %3, %101, %3 in 1 : vector<2x4xf32>, vector<2x16xf32>, vector<2x4xf32> -> vector<2x24xf32>
    %c2_31 = arith.constant 2 : index
    %c0_32 = arith.constant 0 : index
    %103 = memref.load %arg2[%c2_31, %c0_32] : memref<4x9xf32, #tpu.memory_space<smem>>
    %104 = vector.extract_strided_slice %102 {offsets = [0, 0], sizes = [2, 16], strides = [1, 1]} : vector<2x24xf32> to vector<2x16xf32>
    %105 = vector.broadcast %103 : f32 to vector<2x16xf32>
    %106 = arith.mulf %105, %104 : vector<2x16xf32>
    %107 = arith.addf %99, %106 : vector<2x16xf32>
    %c2_33 = arith.constant 2 : index
    %c1_34 = arith.constant 1 : index
    %108 = memref.load %arg2[%c2_33, %c1_34] : memref<4x9xf32, #tpu.memory_space<smem>>
    %109 = vector.extract_strided_slice %102 {offsets = [0, 1], sizes = [2, 16], strides = [1, 1]} : vector<2x24xf32> to vector<2x16xf32>
    %110 = vector.broadcast %108 : f32 to vector<2x16xf32>
    %111 = arith.mulf %110, %109 : vector<2x16xf32>
    %112 = arith.addf %107, %111 : vector<2x16xf32>
    %c2_35 = arith.constant 2 : index
    %c2_36 = arith.constant 2 : index
    %113 = memref.load %arg2[%c2_35, %c2_36] : memref<4x9xf32, #tpu.memory_space<smem>>
    %114 = vector.extract_strided_slice %102 {offsets = [0, 2], sizes = [2, 16], strides = [1, 1]} : vector<2x24xf32> to vector<2x16xf32>
    %115 = vector.broadcast %113 : f32 to vector<2x16xf32>
    %116 = arith.mulf %115, %114 : vector<2x16xf32>
    %117 = arith.addf %112, %116 : vector<2x16xf32>
    %c2_37 = arith.constant 2 : index
    %c3_38 = arith.constant 3 : index
    %118 = memref.load %arg2[%c2_37, %c3_38] : memref<4x9xf32, #tpu.memory_space<smem>>
    %119 = vector.extract_strided_slice %102 {offsets = [0, 3], sizes = [2, 16], strides = [1, 1]} : vector<2x24xf32> to vector<2x16xf32>
    %120 = vector.broadcast %118 : f32 to vector<2x16xf32>
    %121 = arith.mulf %120, %119 : vector<2x16xf32>
    %122 = arith.addf %117, %121 : vector<2x16xf32>
    %c2_39 = arith.constant 2 : index
    %c4_40 = arith.constant 4 : index
    %123 = memref.load %arg2[%c2_39, %c4_40] : memref<4x9xf32, #tpu.memory_space<smem>>
    %124 = vector.extract_strided_slice %102 {offsets = [0, 4], sizes = [2, 16], strides = [1, 1]} : vector<2x24xf32> to vector<2x16xf32>
    %125 = vector.broadcast %123 : f32 to vector<2x16xf32>
    %126 = arith.mulf %125, %124 : vector<2x16xf32>
    %127 = arith.addf %122, %126 : vector<2x16xf32>
    %c2_41 = arith.constant 2 : index
    %c5_42 = arith.constant 5 : index
    %128 = memref.load %arg2[%c2_41, %c5_42] : memref<4x9xf32, #tpu.memory_space<smem>>
    %129 = vector.extract_strided_slice %102 {offsets = [0, 5], sizes = [2, 16], strides = [1, 1]} : vector<2x24xf32> to vector<2x16xf32>
    %130 = vector.broadcast %128 : f32 to vector<2x16xf32>
    %131 = arith.mulf %130, %129 : vector<2x16xf32>
    %132 = arith.addf %127, %131 : vector<2x16xf32>
    %c2_43 = arith.constant 2 : index
    %c6_44 = arith.constant 6 : index
    %133 = memref.load %arg2[%c2_43, %c6_44] : memref<4x9xf32, #tpu.memory_space<smem>>
    %134 = vector.extract_strided_slice %102 {offsets = [0, 6], sizes = [2, 16], strides = [1, 1]} : vector<2x24xf32> to vector<2x16xf32>
    %135 = vector.broadcast %133 : f32 to vector<2x16xf32>
    %136 = arith.mulf %135, %134 : vector<2x16xf32>
    %137 = arith.addf %132, %136 : vector<2x16xf32>
    %c2_45 = arith.constant 2 : index
    %c7_46 = arith.constant 7 : index
    %138 = memref.load %arg2[%c2_45, %c7_46] : memref<4x9xf32, #tpu.memory_space<smem>>
    %139 = vector.extract_strided_slice %102 {offsets = [0, 7], sizes = [2, 16], strides = [1, 1]} : vector<2x24xf32> to vector<2x16xf32>
    %140 = vector.broadcast %138 : f32 to vector<2x16xf32>
    %141 = arith.mulf %140, %139 : vector<2x16xf32>
    %142 = arith.addf %137, %141 : vector<2x16xf32>
    %c2_47 = arith.constant 2 : index
    %c8_48 = arith.constant 8 : index
    %143 = memref.load %arg2[%c2_47, %c8_48] : memref<4x9xf32, #tpu.memory_space<smem>>
    %144 = vector.extract_strided_slice %102 {offsets = [0, 8], sizes = [2, 16], strides = [1, 1]} : vector<2x24xf32> to vector<2x16xf32>
    %145 = vector.broadcast %143 : f32 to vector<2x16xf32>
    %146 = arith.mulf %145, %144 : vector<2x16xf32>
    %147 = arith.addf %142, %146 : vector<2x16xf32>
    %148 = vector.extract_strided_slice %1 {offsets = [0, 3, 0], sizes = [2, 1, 16], strides = [1, 1, 1]} : vector<2x4x16xf32> to vector<2x1x16xf32>
    %149 = vector.shape_cast %148 : vector<2x1x16xf32> to vector<2x16xf32>
    %150 = tpu.concatenate %3, %149, %3 in 1 : vector<2x4xf32>, vector<2x16xf32>, vector<2x4xf32> -> vector<2x24xf32>
    %c3_49 = arith.constant 3 : index
    %c0_50 = arith.constant 0 : index
    %151 = memref.load %arg2[%c3_49, %c0_50] : memref<4x9xf32, #tpu.memory_space<smem>>
    %152 = vector.extract_strided_slice %150 {offsets = [0, 0], sizes = [2, 16], strides = [1, 1]} : vector<2x24xf32> to vector<2x16xf32>
    %153 = vector.broadcast %151 : f32 to vector<2x16xf32>
    %154 = arith.mulf %153, %152 : vector<2x16xf32>
    %155 = arith.addf %147, %154 : vector<2x16xf32>
    %c3_51 = arith.constant 3 : index
    %c1_52 = arith.constant 1 : index
    %156 = memref.load %arg2[%c3_51, %c1_52] : memref<4x9xf32, #tpu.memory_space<smem>>
    %157 = vector.extract_strided_slice %150 {offsets = [0, 1], sizes = [2, 16], strides = [1, 1]} : vector<2x24xf32> to vector<2x16xf32>
    %158 = vector.broadcast %156 : f32 to vector<2x16xf32>
    %159 = arith.mulf %158, %157 : vector<2x16xf32>
    %160 = arith.addf %155, %159 : vector<2x16xf32>
    %c3_53 = arith.constant 3 : index
    %c2_54 = arith.constant 2 : index
    %161 = memref.load %arg2[%c3_53, %c2_54] : memref<4x9xf32, #tpu.memory_space<smem>>
    %162 = vector.extract_strided_slice %150 {offsets = [0, 2], sizes = [2, 16], strides = [1, 1]} : vector<2x24xf32> to vector<2x16xf32>
    %163 = vector.broadcast %161 : f32 to vector<2x16xf32>
    %164 = arith.mulf %163, %162 : vector<2x16xf32>
    %165 = arith.addf %160, %164 : vector<2x16xf32>
    %c3_55 = arith.constant 3 : index
    %c3_56 = arith.constant 3 : index
    %166 = memref.load %arg2[%c3_55, %c3_56] : memref<4x9xf32, #tpu.memory_space<smem>>
    %167 = vector.extract_strided_slice %150 {offsets = [0, 3], sizes = [2, 16], strides = [1, 1]} : vector<2x24xf32> to vector<2x16xf32>
    %168 = vector.broadcast %166 : f32 to vector<2x16xf32>
    %169 = arith.mulf %168, %167 : vector<2x16xf32>
    %170 = arith.addf %165, %169 : vector<2x16xf32>
    %c3_57 = arith.constant 3 : index
    %c4_58 = arith.constant 4 : index
    %171 = memref.load %arg2[%c3_57, %c4_58] : memref<4x9xf32, #tpu.memory_space<smem>>
    %172 = vector.extract_strided_slice %150 {offsets = [0, 4], sizes = [2, 16], strides = [1, 1]} : vector<2x24xf32> to vector<2x16xf32>
    %173 = vector.broadcast %171 : f32 to vector<2x16xf32>
    %174 = arith.mulf %173, %172 : vector<2x16xf32>
    %175 = arith.addf %170, %174 : vector<2x16xf32>
    %c3_59 = arith.constant 3 : index
    %c5_60 = arith.constant 5 : index
    %176 = memref.load %arg2[%c3_59, %c5_60] : memref<4x9xf32, #tpu.memory_space<smem>>
    %177 = vector.extract_strided_slice %150 {offsets = [0, 5], sizes = [2, 16], strides = [1, 1]} : vector<2x24xf32> to vector<2x16xf32>
    %178 = vector.broadcast %176 : f32 to vector<2x16xf32>
    %179 = arith.mulf %178, %177 : vector<2x16xf32>
    %180 = arith.addf %175, %179 : vector<2x16xf32>
    %c3_61 = arith.constant 3 : index
    %c6_62 = arith.constant 6 : index
    %181 = memref.load %arg2[%c3_61, %c6_62] : memref<4x9xf32, #tpu.memory_space<smem>>
    %182 = vector.extract_strided_slice %150 {offsets = [0, 6], sizes = [2, 16], strides = [1, 1]} : vector<2x24xf32> to vector<2x16xf32>
    %183 = vector.broadcast %181 : f32 to vector<2x16xf32>
    %184 = arith.mulf %183, %182 : vector<2x16xf32>
    %185 = arith.addf %180, %184 : vector<2x16xf32>
    %c3_63 = arith.constant 3 : index
    %c7_64 = arith.constant 7 : index
    %186 = memref.load %arg2[%c3_63, %c7_64] : memref<4x9xf32, #tpu.memory_space<smem>>
    %187 = vector.extract_strided_slice %150 {offsets = [0, 7], sizes = [2, 16], strides = [1, 1]} : vector<2x24xf32> to vector<2x16xf32>
    %188 = vector.broadcast %186 : f32 to vector<2x16xf32>
    %189 = arith.mulf %188, %187 : vector<2x16xf32>
    %190 = arith.addf %185, %189 : vector<2x16xf32>
    %c3_65 = arith.constant 3 : index
    %c8_66 = arith.constant 8 : index
    %191 = memref.load %arg2[%c3_65, %c8_66] : memref<4x9xf32, #tpu.memory_space<smem>>
    %192 = vector.extract_strided_slice %150 {offsets = [0, 8], sizes = [2, 16], strides = [1, 1]} : vector<2x24xf32> to vector<2x16xf32>
    %193 = vector.broadcast %191 : f32 to vector<2x16xf32>
    %194 = arith.mulf %193, %192 : vector<2x16xf32>
    %195 = arith.addf %190, %194 : vector<2x16xf32>
    %196 = math.log %195 : vector<2x16xf32>
    %c0_67 = arith.constant 0 : index
    %c0_68 = arith.constant 0 : index
    %197 = vector.load %arg3[%c0_67, %c0_68] : memref<2x16xf32, #tpu.memory_space<vmem>>, vector<2x16xf32>
    tpu.vector_store %arg3[%c0_67, %c0_68], %196 {strides = array<i32>} : memref<2x16xf32, #tpu.memory_space<vmem>>, vector<2x16xf32>,
    return
  }
  func.func @transform_0(%arg0: i32) -> (i32, i32, i32) {
    %c0_i32 = arith.constant 0 : i32
    %c0_i32_0 = arith.constant 0 : i32
    %c0_i32_1 = arith.constant 0 : i32
    return %arg0, %c0_i32, %c0_i32_0 : i32, i32, i32
  }
  func.func @transform_1(%arg0: i32) -> (i32, i32) {
    %c0_i32 = arith.constant 0 : i32
    %c0_i32_0 = arith.constant 0 : i32
    %c0_i32_1 = arith.constant 0 : i32
    return %c0_i32, %c0_i32_0 : i32, i32
  }
  func.func @transform_2(%arg0: i32) -> (i32, i32) {
    %c0_i32 = arith.constant 0 : i32
    %c0_i32_0 = arith.constant 0 : i32
    return %arg0, %c0_i32 : i32, i32
  }
}

</mosaic_0001>

<bundles_post_ra>
// kernel: tpu_custom_call.1
= control target key start
LH: loop header
LB: loop body
LE: loop exit
PB: predicated region body
PF: predicated region fallthrough
CT: control target
= control target key end

     0   :  { %7 = vsyncpa [#allocation3], 0  ;;  %s622_s0 = inlined_call_operand.hbm [shape: f32[2,4,16], index: 0, kind: input, shape index: {}]   ;;  %s623_s1 = inlined_call_operand.hbm [shape: f32[4,9], index: 1, kind: input, shape index: {}]   ;;  %s624_s2 = inlined_call_operand.hbm [shape: f32[2,16], index: 2, kind: output, shape index: {}]  }
   0x1   :  { %8 = vsyncpa [#allocation5], 0 }
   0x2   :  { %9 = vsyncpa [#allocation4], 0  ;;  %s14_s11 = sshll.u32 %s622_s0, 4  ;;  %s496_s12 = smov [#allocation2]   ;;  %s15_s11 = int_to_ptr.hbm [resolvable:$true] %s14_s11 }
   0x3   :  { %s16_s13 = sshll.u32 %s496_s12, 4  ;;  %s28_s16 = sshll.u32 %s623_s1, 4  ;;  %s17_s13 = int_to_ptr.vmem [resolvable:$true] %s16_s13  ;;  %s29_s16 = int_to_ptr.hbm [resolvable:$true] %s28_s16 }
   0x4   :  { %s497_s17 = smov 64   ;;  %s498_s18 = smov 4  }
   0x5   :  { %22 = dma.hbm_to_vmem [thread:$0]  %s15_s11, 128, %s17_s13, [#allocation3], %s497_s17, %s497_s17, %s498_s18  }
   0x6   :  { %s499_s19 = smov [#allocation6]  }
   0x7   :  { %31 = dma.hbm_to_smem %s29_s16, 64, %s499_s19, [#allocation5]  }
   0x8   :  { %490 = dma.done.wait [#allocation3], 128  }
   0x9   :  { %491 = vsyncadd [#allocation3], 4294967168 }
   0xa   :  { %492 = dma.done.wait [#allocation5], 64  }
   0xb   :  { %493 = vsyncadd [#allocation5], 4294967232 }
   0xc   :  { %40 = sfence }
   0xd   :  { %v41_v0 = vld [vmem:[#allocation2] sm:$0xf]  ;;  %v42_v1 = vld [vmem:[#allocation2 + $0x4] sm:$0xf]  ;;  %vm50_vm0 = vcmask 1041409   ;;  %s379_s0 = sld [smem:[#allocation6 + $0x4]] }
   0xe   :  { %v43_v2 = vmul.f32 1.442695, %v41_v0  ;;  %v45_v3 = vmul.f32 1.442695, %v42_v1  ;;  %s377_s1 = sld [smem:[#allocation6 + $0x2]]  ;;  %vm55_vm1 = vcmask 31744  }
   0xf   :  { %s376_s20 = sld [smem:[#allocation6 + $0x1]]  ;;  %vm57_vm2 = vcmask 162816   ;;  %s500_s24 = smov 124   ;;  %vm356_vm3 = vcmask 123904  }
  0x10   :  { %424 = vpow2.f32 %v43_v2  ;;  %s378_s21 = sld [smem:[#allocation6 + $0x3]]  ;;  %s501_s25 = smov 126  }
  0x11   :  { %426 = vpow2.f32 %v45_v3  ;;  %s385_s22 = sld [smem:[#allocation6 + $0x81]]  ;;  %s502_s26 = smov 127  }
  0x12   :  { %s380_s23 = sld [smem:[#allocation6 + $0x5]]  ;;  %s503_s30 = smov 125  }
  0x13   :  { %v88_v17 = vstv %s379_s0  ;;  %s388_s27 = sld [smem:[#allocation6 + $0x84]]  ;;  %s504_s3 = smov 123  }
  0x14   :  { %v72_v18 = vstv %s377_s1  ;;  %s381_s28 = sld [smem:[#allocation6 + $0x6]]  ;;  %s505_s7 = smov 122  }
  0x15   :  { %v64_v19 = vstv %s376_s20  ;;  %s382_s29 = sld [smem:[#allocation6 + $0x7]]  ;;  %s506_s8 = smov 121  }
  0x16   :  { %v425_v4 = vpop.eup %424  ;;  %v80_v26 = vstv %s378_s21  ;;  %s383_s4 = sld [smem:[#allocation6 + $0x8]]  ;;  %s507_s12 = smov 120  }
  0x17   :  { %v427_v5 = vpop.eup %426  ;;  %v202_v6 = vrot.slane %v425_v4, 2  ;;  %v127_v11 = vrot.slane %v425_v4, 1  ;;  %v278_v13 = vrot.slane %v425_v4, 3  ;;  %v139_v27 = vstv %s385_s22  ;;  %s391_s5 = sld [smem:[#allocation6 + $0x87]] }
  0x18   :  { %v49_v7 = vrot.slane %v427_v5, 7  ;;  %v203_v8 = vrot.slane %v427_v5, 1  ;;  %v279_v14 = vrot.slane %v427_v5, 2  ;;  %v96_v29 = vstv %s380_s23  ;;  %s386_s6 = sld [smem:[#allocation6 + $0x82]] }
  0x19   :  { %v128_v12 = vsel %vm50_vm0, %v427_v5, %v127_v11  ;;  %v163_v34 = vstv %s388_s27  ;;  %s395_s9 = sld [smem:[#allocation6 + $0x102]] }
  0x1a   :  { %v51_v9 = vsel %vm50_vm0, %v49_v7, %v425_v4  ;;  %v204_v10 = vsel %vm50_vm0, %v203_v8, %v202_v6  ;;  %v280_v15 = vsel %vm50_vm0, %v279_v14, %v278_v13  ;;  %v104_v35 = vstv %s381_s28  ;;  %s387_s10 = sld [smem:[#allocation6 + $0x83]] }
  0x1b   :  { %52 = vrot.lane.b32.xlu0 %v51_v9, %s498_s18  ;;  %205 = vrot.lane.b32.xlu1 %v204_v10, %s498_s18  ;;  %v112_v36 = vstv %s382_s29  ;;  %s389_s11 = sld [smem:[#allocation6 + $0x85]] }
  0x1c   :  { %v120_v40 = vstv %s383_s4  ;;  %s398_s13 = sld [smem:[#allocation6 + $0x105]]  ;;  %s508_s4 = smov [#allocation7]  }
  0x1d   :  { %v187_v41 = vstv %s391_s5  ;;  %s390_s14 = sld [smem:[#allocation6 + $0x86]]  ;;  %s363_s5 = sshll.u32 %s508_s4, 4  ;;  %s364_s5 = int_to_ptr.vmem [resolvable:$true] %s363_s5 }
  0x1e   :  { %v147_v43 = vstv %s386_s6  ;;  %s392_s15 = sld [smem:[#allocation6 + $0x88]] }
  0x1f   :  { %v223_v49 = vstv %s395_s9  ;;  %s394_s16 = sld [smem:[#allocation6 + $0x101]] }
  0x20   :  { %v155_v50 = vstv %s387_s10  ;;  %s401_s17 = sld [smem:[#allocation6 + $0x108]] }
  0x21   :  { %v171_v51 = vstv %s389_s11  ;;  %s405_s19 = sld [smem:[#allocation6 + $0x183]] }
  0x22   :  { %v247_v55 = vstv %s398_s13  ;;  %s397_s0 = sld [smem:[#allocation6 + $0x104]] }
  0x23   :  { %129 = vrot.lane.b32.xlu0 %v128_v12, %s498_s18  ;;  %v179_v56 = vstv %s390_s14  ;;  %s399_s1 = sld [smem:[#allocation6 + $0x106]] }
  0x24   :  { %v195_v57 = vstv %s392_s15  ;;  %s408_s20 = sld [smem:[#allocation6 + $0x186]] }
  0x25   :  { %v215_v61 = vstv %s394_s16  ;;  %s403_s21 = sld [smem:[#allocation6 + $0x181]] }
  0x26   :  { %v271_v62 = vstv %s401_s17  ;;  %s400_s22 = sld [smem:[#allocation6 + $0x107]] }
  0x27   :  { %v307_v6 = vstv %s405_s19  ;;  %s404_s23 = sld [smem:[#allocation6 + $0x182]] }
  0x28   :  { %v239_v7 = vstv %s397_s0  ;;  %s406_s27 = sld [smem:[#allocation6 + $0x184]] }
  0x29   :  { %v255_v8 = vstv %s399_s1  ;;  %s407_s28 = sld [smem:[#allocation6 + $0x185]] }
  0x2a   :  { %v331_v12 = vstv %s408_s20  ;;  %s409_s29 = sld [smem:[#allocation6 + $0x187]] }
  0x2b   :  { %281 = vrot.lane.b32.xlu0 %v280_v15, %s498_s18  ;;  %s396_s18 = sld [smem:[#allocation6 + $0x103]]  ;;  %v291_v13 = vstv %s403_s21 }
  0x2c   :  { %v263_v14 = vstv %s400_s22 }
  0x31   :  { %v231_v0 = vstv %s396_s18 }
  0x8d   :  { %v53_v16 = vpop.permute.xlu0 %52  ;;  %v206_v42 = vpop.permute.xlu1 %205 }
  0x8e   :  { %v56_v20 = vsel %vm55_vm1, 0.0, %v53_v16  ;;  %v208_v46 = vsel %vm55_vm1, 0.0, %v206_v42 }
  0x8f   :  { %v537_v21 = vsel %vm57_vm2, %v56_v20, 0.0  ;;  %v569_v48 = vsel %vm57_vm2, %v208_v46, 0.0 }
  0x90   :  { %v89_v22 = vmul.f32 %v88_v17, %v537_v21  ;;  %v73_v23 = vmul.f32 %v72_v18, %v537_v21  ;;  %v65_v24 = vmul.f32 %v64_v19, %v537_v21  ;;  %v81_v31 = vmul.f32 %v80_v26, %v537_v21 }
  0x91   :  { %v97_v33 = vmul.f32 %v96_v29, %v537_v21  ;;  %v105_v38 = vmul.f32 %v104_v35, %v537_v21  ;;  %v113_v39 = vmul.f32 %v112_v36, %v537_v21  ;;  %v121_v44 = vmul.f32 %v120_v40, %v537_v21 }
  0x92   :  { %91 = vrot.lane.b32.xlu0 %v89_v22, %s500_s24  ;;  %75 = vrot.lane.b32.xlu2 %v73_v23, %s501_s25  ;;  %v224_v52 = vmul.f32 %v223_v49, %v569_v48  ;;  %v248_v58 = vmul.f32 %v247_v55, %v569_v48  ;;  %v216_v1 = vmul.f32 %v215_v61, %v569_v48  ;;  %v299_v18 = vstv %s404_s23 }
  0x93   :  { %67 = vrot.lane.b32.xlu1 %v65_v24, %s502_s26  ;;  %v272_v2 = vmul.f32 %v271_v62, %v569_v48  ;;  %v232_v4 = vmul.f32 %v231_v0, %v569_v48  ;;  %v240_v10 = vmul.f32 %v239_v7, %v569_v48  ;;  %v256_v11 = vmul.f32 %v255_v8, %v569_v48 }
  0x94   :  { %v264_v17 = vmul.f32 %v263_v14, %v569_v48  ;;  %v315_v19 = vstv %s406_s27  ;;  %v323_v23 = vstv %s407_s28  ;;  %v339_v24 = vstv %s409_s29 }
  0x95   :  { %v130_v25 = vpop.permute.xlu0 %129 }
  0x96   :  { %v132_v28 = vsel %vm55_vm1, 0.0, %v130_v25 }
  0x97   :  { %v547_v30 = vsel %vm57_vm2, %v132_v28, 0.0 }
  0x98   :  { %v140_v32 = vmul.f32 %v139_v27, %v547_v30  ;;  %v164_v37 = vmul.f32 %v163_v34, %v547_v30  ;;  %v188_v45 = vmul.f32 %v187_v41, %v547_v30  ;;  %v148_v47 = vmul.f32 %v147_v43, %v547_v30 }
  0x99   :  { %v156_v53 = vmul.f32 %v155_v50, %v547_v30  ;;  %v172_v54 = vmul.f32 %v171_v51, %v547_v30  ;;  %v180_v59 = vmul.f32 %v179_v56, %v547_v30  ;;  %v196_v60 = vmul.f32 %v195_v57, %v547_v30 }
  0x9a   :  { %83 = vrot.lane.b32.xlu2 %v81_v31, %s503_s30  ;;  %142 = vrot.lane.b32.xlu0 %v140_v32, %s502_s26 }
  0x9b   :  { %99 = vrot.lane.b32.xlu1 %v97_v33, %s504_s3 }
  0x9d   :  { %v282_v63 = vpop.permute.xlu0 %281 }
  0x9e   :  { %v284_v3 = vsel %vm55_vm1, 0.0, %v282_v63 }
  0x9f   :  { %v591_v5 = vsel %vm57_vm2, %v284_v3, 0.0 }
  0xa0   :  { %v308_v9 = vmul.f32 %v307_v6, %v591_v5  ;;  %v332_v15 = vmul.f32 %v331_v12, %v591_v5  ;;  %v292_v16 = vmul.f32 %v291_v13, %v591_v5  ;;  %v300_v20 = vmul.f32 %v299_v18, %v591_v5 }
  0xa1   :  { %v316_v22 = vmul.f32 %v315_v19, %v591_v5  ;;  %v324_v25 = vmul.f32 %v323_v23, %v591_v5  ;;  %v340_v26 = vmul.f32 %v339_v24, %v591_v5 }
  0xa2   :  { %107 = vrot.lane.b32.xlu2 %v105_v38, %s505_s7  ;;  %166 = vrot.lane.b32.xlu0 %v164_v37, %s500_s24 }
  0xa3   :  { %115 = vrot.lane.b32.xlu1 %v113_v39, %s506_s8 }
  0xaa   :  { %123 = vrot.lane.b32.xlu2 %v121_v44, %s507_s12  ;;  %190 = vrot.lane.b32.xlu0 %v188_v45, %s506_s8 }
  0xab   :  { %150 = vrot.lane.b32.xlu1 %v148_v47, %s501_s25 }
  0xb2   :  { %158 = vrot.lane.b32.xlu2 %v156_v53, %s503_s30  ;;  %226 = vrot.lane.b32.xlu0 %v224_v52, %s501_s25 }
  0xb3   :  { %174 = vrot.lane.b32.xlu1 %v172_v54, %s504_s3 }
  0xba   :  { %182 = vrot.lane.b32.xlu2 %v180_v59, %s505_s7  ;;  %250 = vrot.lane.b32.xlu0 %v248_v58, %s504_s3 }
  0xbb   :  { %198 = vrot.lane.b32.xlu1 %v196_v60, %s507_s12 }
  0xc2   :  { %218 = vrot.lane.b32.xlu2 %v216_v1, %s502_s26  ;;  %274 = vrot.lane.b32.xlu0 %v272_v2, %s507_s12 }
  0xc3   :  { %234 = vrot.lane.b32.xlu1 %v232_v4, %s503_s30 }
  0xca   :  { %242 = vrot.lane.b32.xlu2 %v240_v10, %s500_s24  ;;  %310 = vrot.lane.b32.xlu0 %v308_v9, %s503_s30  ;;  %s410_s30 = sld [smem:[#allocation6 + $0x188]] }
  0xcb   :  { %258 = vrot.lane.b32.xlu1 %v256_v11, %s505_s7 }
  0xd0   :  { %v347_v27 = vstv %s410_s30 }
  0xd1   :  { %v348_v28 = vmul.f32 %v347_v27, %v591_v5 }
  0xd2   :  { %266 = vrot.lane.b32.xlu2 %v264_v17, %s506_s8  ;;  %334 = vrot.lane.b32.xlu0 %v332_v15, %s505_s7 }
  0xd3   :  { %294 = vrot.lane.b32.xlu1 %v292_v16, %s502_s26  ;;  %s393_s26 = sld [smem:[#allocation6 + $0x100]] }
  0xd9   :  { %v211_v2 = vstv %s393_s26 }
  0xda   :  { %302 = vrot.lane.b32.xlu2 %v300_v20, %s501_s25  ;;  %s59_s25 = sld [smem:[#allocation6]]  ;;  %v212_v6 = vmul.f32 %v211_v2, %v569_v48 }
  0xdb   :  { %318 = vrot.lane.b32.xlu1 %v316_v22, %s500_s24  ;;  %s384_s24 = sld [smem:[#allocation6 + $0x80]] }
  0xe0   :  { %v60_v33 = vstv %s59_s25 }
  0xe1   :  { %v61_v34 = vmul.f32 %v60_v33, %v537_v21  ;;  %v135_v49 = vstv %s384_s24 }
  0xe2   :  { %326 = vrot.lane.b32.xlu2 %v324_v25, %s504_s3  ;;  %v136_v21 = vmul.f32 %v135_v49, %v547_v30  ;;  %s402_s3 = sld [smem:[#allocation6 + $0x180]] }
  0xe3   :  { %342 = vrot.lane.b32.xlu1 %v340_v26, %s506_s8  ;;  %s365_s8 = sshll.u32 %s624_s2, 4  ;;  %s366_s8 = int_to_ptr.hbm [resolvable:$true] %s365_s8 }
  0xe8   :  { %v287_v20 = vstv %s402_s3 }
  0xe9   :  { %v288_v48 = vmul.f32 %v287_v20, %v591_v5 }
  0xea   :  { %350 = vrot.lane.b32.xlu2 %v348_v28, %s507_s12 }
  0xec   :  { %v76_v29 = vpop.permute.xlu2 %75 }
  0xf4   :  { %v84_v31 = vpop.permute.xlu2 %83 }
  0xfc   :  { %v108_v32 = vpop.permute.xlu2 %107 }
 0x104   :  { %v92_v35 = vpop.permute.xlu0 %91  ;;  %v124_v38 = vpop.permute.xlu2 %123 }
 0x105   :  { %v68_v36 = vpop.permute.xlu1 %67 }
 0x106   :  { %v70_v37 = vadd.f32 %v68_v36, %v61_v34 }
 0x108   :  { %v78_v39 = vadd.f32 %v76_v29, %v70_v37 }
 0x10a   :  { %v86_v40 = vadd.f32 %v84_v31, %v78_v39 }
 0x10c   :  { %v94_v41 = vadd.f32 %v92_v35, %v86_v40  ;;  %v143_v43 = vpop.permute.xlu0 %142  ;;  %v159_v45 = vpop.permute.xlu2 %158 }
 0x10d   :  { %v100_v42 = vpop.permute.xlu1 %99 }
 0x10e   :  { %v102_v44 = vadd.f32 %v100_v42, %v94_v41 }
 0x110   :  { %v110_v46 = vadd.f32 %v108_v32, %v102_v44 }
 0x114   :  { %v167_v51 = vpop.permute.xlu0 %166  ;;  %v183_v54 = vpop.permute.xlu2 %182 }
 0x115   :  { %v116_v47 = vpop.permute.xlu1 %115 }
 0x116   :  { %v118_v50 = vadd.f32 %v116_v47, %v110_v46 }
 0x118   :  { %v126_v52 = vadd.f32 %v124_v38, %v118_v50 }
 0x11a   :  { %v137_v53 = vadd.f32 %v136_v21, %v126_v52 }
 0x11c   :  { %v145_v55 = vadd.f32 %v143_v43, %v137_v53  ;;  %v191_v59 = vpop.permute.xlu0 %190  ;;  %v219_v61 = vpop.permute.xlu2 %218 }
 0x11d   :  { %v151_v56 = vpop.permute.xlu1 %150 }
 0x11e   :  { %v153_v57 = vadd.f32 %v151_v56, %v145_v55 }
 0x120   :  { %v161_v58 = vadd.f32 %v159_v45, %v153_v57 }
 0x122   :  { %v169_v60 = vadd.f32 %v167_v51, %v161_v58 }
 0x124   :  { %v227_v1 = vpop.permute.xlu0 %226  ;;  %v243_v7 = vpop.permute.xlu2 %242 }
 0x125   :  { %v175_v62 = vpop.permute.xlu1 %174 }
 0x126   :  { %v177_v63 = vadd.f32 %v175_v62, %v169_v60 }
 0x128   :  { %v185_v0 = vadd.f32 %v183_v54, %v177_v63 }
 0x12a   :  { %v193_v3 = vadd.f32 %v191_v59, %v185_v0 }
 0x12c   :  { %v251_v11 = vpop.permute.xlu0 %250  ;;  %v267_v15 = vpop.permute.xlu2 %266 }
 0x12d   :  { %v199_v4 = vpop.permute.xlu1 %198 }
 0x12e   :  { %v201_v30 = vadd.f32 %v199_v4, %v193_v3 }
 0x130   :  { %v213_v8 = vadd.f32 %v212_v6, %v201_v30 }
 0x132   :  { %v221_v9 = vadd.f32 %v219_v61, %v213_v8 }
 0x134   :  { %v229_v10 = vadd.f32 %v227_v1, %v221_v9  ;;  %v275_v19 = vpop.permute.xlu0 %274  ;;  %v303_v24 = vpop.permute.xlu2 %302 }
 0x135   :  { %v235_v12 = vpop.permute.xlu1 %234 }
 0x136   :  { %v237_v13 = vadd.f32 %v235_v12, %v229_v10 }
 0x138   :  { %v245_v14 = vadd.f32 %v243_v7, %v237_v13 }
 0x13a   :  { %v253_v16 = vadd.f32 %v251_v11, %v245_v14 }
 0x13c   :  { %v311_v29 = vpop.permute.xlu0 %310  ;;  %v327_v32 = vpop.permute.xlu2 %326 }
 0x13d   :  { %v259_v17 = vpop.permute.xlu1 %258 }
 0x13e   :  { %v261_v18 = vadd.f32 %v259_v17, %v253_v16 }
 0x140   :  { %v269_v22 = vadd.f32 %v267_v15, %v261_v18 }
 0x142   :  { %v277_v23 = vadd.f32 %v275_v19, %v269_v22 }
 0x144   :  { %v289_v25 = vadd.f32 %v288_v48, %v277_v23  ;;  %v335_v36 = vpop.permute.xlu0 %334  ;;  %v351_v40 = vpop.permute.xlu2 %350 }
 0x145   :  { %v295_v26 = vpop.permute.xlu1 %294 }
 0x146   :  { %v297_v27 = vadd.f32 %v295_v26, %v289_v25 }
 0x148   :  { %v305_v28 = vadd.f32 %v303_v24, %v297_v27 }
 0x14a   :  { %v313_v31 = vadd.f32 %v311_v29, %v305_v28 }
 0x14d   :  { %v319_v33 = vpop.permute.xlu1 %318 }
 0x14e   :  { %v321_v34 = vadd.f32 %v319_v33, %v313_v31 }
 0x150   :  { %v329_v35 = vadd.f32 %v327_v32, %v321_v34 }
 0x152   :  { %v337_v37 = vadd.f32 %v335_v36, %v329_v35 }
 0x155   :  { %v343_v38 = vpop.permute.xlu1 %342 }
 0x156   :  { %v345_v39 = vadd.f32 %v343_v38, %v337_v37 }
 0x158   :  { %v353_v41 = vadd.f32 %v351_v40, %v345_v39 }
 0x15a   :  { %428 = vlog2.f32 %v353_v41 }
 0x160   :  { %v429_v5 = vpop.eup %428 }
 0x161   :  { %v355_v42 = vmul.f32 0.6931472, %v429_v5 }
 0x163   :  { %357 = vst.msk [vmem:[#allocation7] sm:$0x3] %vm356_vm3, %v355_v42 }
 0x164   :  { %368 = dma.vmem_to_hbm [thread:$0]  %s364_s5, 32, %s366_s8, [#allocation4]  }
 0x165   :  { %494 = dma.done.wait [#allocation4], 32  }
 0x166   :  { %495 = vsyncadd [#allocation4], 4294967264 }
 0x167   :  { %373 = vsyncpa [#allocation3], 1 }
 0x168   :  { %374 = vsyncpa [#allocation4], 1 }
 0x169   :  { %375 = vsyncpa [#allocation5], 1 }

</bundles_post_ra>
